<compile_context>
chip_gen: v7x
topology: tpu7x:2x2x1
jax: 0.10.0
libtpu: 0.0.40
codegen_flags: <defaults>
</compile_context>

<pallas_src>
import functools

import jax
import jax.numpy as jnp
from jax.experimental import pallas as pl
from jax.experimental.pallas import tpu as pltpu

ATT_SIZE = 2          # args['att_size']
EMBED_SIZE = 256      # args['embed_size'] (linear/bn declared in __init__, unused for 'transformer')
FINETUNE_CNN = False  # args['finetune_cnn']
BN_EPS = 1e-5
LANE = 128            # minimum lane-dense channel width


def _cparams(rank):
    # All grid axes are independent output tiles -> "parallel" (shards across the
    # two TensorCores on v7x, harmless on single-TC v5e/v6e).
    return pltpu.CompilerParams(
        dimension_semantics=("parallel",) * rank,
        vmem_limit_bytes=48 * 1024 * 1024,
    )


def _tile_m(m):
    """Largest row tile in {512,256,128} dividing m; otherwise pad m (no truncation)."""
    for t in (512, 256, 128):
        if m % t == 0:
            return t, m
    if m <= 512:
        mp = -(-m // 8) * 8
        return mp, mp
    t = 128
    return t, -(-m // t) * t


def _tile_n(n):
    """Lane tile: 256 when it divides, else the full (already lane-friendly) width."""
    return 256 if n % 256 == 0 else n


def _pad_ch(c):
    return max(c, LANE)


# --------------------------- Pallas kernels ---------------------------------

def _conv_kernel(*refs, taps, relu, has_res):
    """acc = sum_t a_t @ w_t  (bf16 in, f32 acc);  out = [relu](acc + shift [+ res])."""
    a_refs = refs[:taps]
    w_ref = refs[taps]           # [taps, K, tn] bf16 (BN scale folded in)
    shift_ref = refs[taps + 1]   # [1, tn] f32
    res_ref = refs[taps + 2] if has_res else None
    o_ref = refs[-1]

    acc = jnp.dot(a_refs[0][...], w_ref[0], preferred_element_type=jnp.float32)
    for t in range(1, taps):
        acc = acc + jnp.dot(a_refs[t][...], w_ref[t], preferred_element_type=jnp.float32)
    acc = acc + shift_ref[...]
    if has_res:
        acc = acc + res_ref[...].astype(jnp.float32)
    if relu:
        acc = jnp.maximum(acc, 0.0)
    o_ref[...] = acc.astype(o_ref.dtype)


def _max_kernel(*refs):
    """Elementwise max over all window inputs (in-kernel maxpool reduce)."""
    o_ref = refs[-1]
    acc = refs[0][...]
    for r in refs[1:-1]:
        acc = jnp.maximum(acc, r[...])
    o_ref[...] = acc


def _mean_kernel(*refs, inv_p):
    """f32 mean over all window inputs (in-kernel avgpool reduce)."""
    o_ref = refs[-1]
    acc = refs[0][...].astype(jnp.float32)
    for r in refs[1:-1]:
        acc = acc + r[...].astype(jnp.float32)
    o_ref[...] = (acc * inv_p).astype(o_ref.dtype)


# --------------------------- conv / pool wrappers ---------------------------

@functools.partial(jax.jit, static_argnames=("ksize", "stride", "relu", "has_res"))
def _conv_bn_jit(x, w, shift, res, ksize, stride, relu, has_res):
    """x: [B,H,W,Cin] NHWC bf16; w: [ksize*ksize, Cin, Cout] bf16 (scale folded);
    shift: [1, Cout] f32.  Returns [relu](conv(x) + shift [+ res]) in bf16 NHWC."""
    b, h, wd, cin = x.shape
    taps, _, cout = w.shape
    pad = ksize // 2
    ho = (h + 2 * pad - ksize) // stride + 1
    wo = (wd + 2 * pad - ksize) // stride + 1
    if pad:
        x = jnp.pad(x, ((0, 0), (pad, pad), (pad, pad), (0, 0)))
    m = b * ho * wo

    # ksize^2 strided taps of the (padded) input, each an [M, Cin] matrix — no
    # concatenated im2col matrix round-trips HBM for the 3x3 convs.
    a_list = []
    for di in range(ksize):
        for dj in range(ksize):
            a_list.append(
                jax.lax.slice(
                    x,
                    (0, di, dj, 0),
                    (b, di + (ho - 1) * stride + 1, dj + (wo - 1) * stride + 1, cin),
                    (1, stride, stride, 1),
                ).reshape(m, cin)
            )
    if cin < 64 and taps > 1:
        # Stem only (Cin=3): concatenate taps so the single MXU dot has K=147.
        a_list = [jnp.concatenate(a_list, axis=-1)]
        w = w.reshape(1, taps * cin, cout)
    taps_eff = len(a_list)
    k_dim = a_list[0].shape[1]

    tm, mp = _tile_m(m)
    tn = _tile_n(cout)
    if mp != m:
        a_list = [jnp.pad(a, ((0, mp - m), (0, 0))) for a in a_list]

    in_specs = [pl.BlockSpec((tm, k_dim), lambda i, j: (i, 0)) for _ in range(taps_eff)]
    in_specs.append(pl.BlockSpec((taps_eff, k_dim, tn), lambda i, j: (0, 0, j)))
    in_specs.append(pl.BlockSpec((1, tn), lambda i, j: (0, j)))
    args = a_list + [w, shift]
    if has_res:
        res2d = res.reshape(m, cout)
        if mp != m:
            res2d = jnp.pad(res2d, ((0, mp - m), (0, 0)))
        in_specs.append(pl.BlockSpec((tm, tn), lambda i, j: (i, j)))
        args.append(res2d)

    out = pl.pallas_call(
        functools.partial(_conv_kernel, taps=taps_eff, relu=relu, has_res=has_res),
        out_shape=jax.ShapeDtypeStruct((mp, cout), jnp.bfloat16),
        grid=(mp // tm, cout // tn),
        in_specs=in_specs,
        out_specs=pl.BlockSpec((tm, tn), lambda i, j: (i, j)),
        compiler_params=_cparams(2),
    )(*args)
    if mp != m:
        out = out[:m]
    return out.reshape(b, ho, wo, cout)


def conv_bn(x, layer, stride=1, relu=True, residual=None):
    dummy = residual if residual is not None else jnp.zeros((), jnp.float32)
    return _conv_bn_jit(
        x, layer["w"], layer["shift"], dummy,
        ksize=layer["k"], stride=stride, relu=relu, has_res=residual is not None,
    )


@jax.jit
def _maxpool_3x3_s2(x):
    """3x3/2 maxpool; the 9 strided window views are separate kernel inputs."""
    b, h, w, c = x.shape
    xp = jnp.pad(x, ((0, 0), (1, 1), (1, 1), (0, 0)), constant_values=-jnp.inf)
    ho = (h + 2 - 3) // 2 + 1
    wo = (w + 2 - 3) // 2 + 1
    m = b * ho * wo
    wins = []
    for di in range(3):
        for dj in range(3):
            wins.append(
                jax.lax.slice(
                    xp,
                    (0, di, dj, 0),
                    (b, di + (ho - 1) * 2 + 1, dj + (wo - 1) * 2 + 1, c),
                    (1, 2, 2, 1),
                ).reshape(m, c)
            )
    tm, mp = _tile_m(m)
    tn = _tile_n(c)
    if mp != m:
        wins = [jnp.pad(v, ((0, mp - m), (0, 0))) for v in wins]
    out = pl.pallas_call(
        _max_kernel,
        out_shape=jax.ShapeDtypeStruct((mp, c), x.dtype),
        grid=(mp // tm, c // tn),
        in_specs=[pl.BlockSpec((tm, tn), lambda i, j: (i, j)) for _ in wins],
        out_specs=pl.BlockSpec((tm, tn), lambda i, j: (i, j)),
        compiler_params=_cparams(2),
    )(*wins)
    if mp != m:
        out = out[:m]
    return out.reshape(b, ho, wo, c)


@functools.partial(jax.jit, static_argnames=("att_size",))
def _adaptive_avgpool_tokens(x, att_size):
    """AdaptiveAvgPool2d((att,att)) + permute(0,2,3,1) + view(B,-1,C), f32 output."""
    b, h, w, c = x.shape
    # TODO(synk): only the uniform-bin case (H,W divisible by att_size) is implemented;
    # PyTorch AdaptiveAvgPool2d also supports ragged/overlapping bins.
    assert h % att_size == 0 and w % att_size == 0
    kh, kw = h // att_size, w // att_size
    xr = x.reshape(b, att_size, kh, att_size, kw, c)
    m = b * att_size * att_size
    wins = []
    for p in range(kh):
        for q in range(kw):
            wins.append(xr[:, :, p, :, q, :].reshape(m, c))
    tm, mp = _tile_m(m)
    tn = _tile_n(c)
    if mp != m:
        wins = [jnp.pad(v, ((0, mp - m), (0, 0))) for v in wins]
    out = pl.pallas_call(
        functools.partial(_mean_kernel, inv_p=1.0 / (kh * kw)),
        out_shape=jax.ShapeDtypeStruct((mp, c), jnp.float32),
        grid=(mp // tm, c // tn),
        in_specs=[pl.BlockSpec((tm, tn), lambda i, j: (i, j)) for _ in wins],
        out_specs=pl.BlockSpec((tm, tn), lambda i, j: (i, j)),
        compiler_params=_cparams(2),
    )(*wins)
    if mp != m:
        out = out[:m]
    return out.reshape(b, att_size * att_size, c)  # token order == PyTorch permute+view


# --------------------------- ResNet-101 trunk -------------------------------

def _init_conv_bn(key, ksize, cin, cout, cin_pad=None, cout_pad=None, gamma_scale=1.0):
    """Conv weight [k*k, Cin, Cout] with eval-mode BN folded in (scale -> weights,
    shift kept for the epilogue), zero-padded to lane-dense channel widths, bf16."""
    cin_p = cin if cin_pad is None else cin_pad
    cout_p = cout if cout_pad is None else cout_pad
    kw_, kg, kb, km, kv = jax.random.split(key, 5)
    fan_in = ksize * ksize * cin
    w = jax.random.normal(kw_, (ksize * ksize, cin, cout), jnp.float32) * jnp.sqrt(2.0 / fan_in)
    gamma = gamma_scale * (1.0 + 0.1 * jax.random.normal(kg, (cout,), jnp.float32))
    beta = 0.05 * jax.random.normal(kb, (cout,), jnp.float32)
    mean = 0.05 * jax.random.normal(km, (cout,), jnp.float32)
    var = 1.0 + 0.1 * jax.random.uniform(kv, (cout,), jnp.float32)
    scale = gamma / jnp.sqrt(var + BN_EPS)       # eval-mode BN
    shift = beta - mean * scale
    w = w * scale                                # fold scale into the weight columns
    # TODO(synk): real torchvision weights are OIHW; permute to [kh*kw, Cin, Cout] before use.
    w = jnp.pad(w, ((0, 0), (0, cin_p - cin), (0, cout_p - cout)))   # padded ch stay exactly 0
    shift = jnp.pad(shift, (0, cout_p - cout))
    return {
        "w": w.astype(jnp.bfloat16),
        "shift": shift.reshape(1, cout_p).astype(jnp.float32),
        "k": ksize,
    }


def build_resnet101_params(key):
    """ResNet-101 trunk (conv1..layer4) with deterministic synthetic folded-BN weights."""
    keys = iter(jax.random.split(key, 160))
    params = {}
    stem_pad = _pad_ch(64)
    params["stem"] = _init_conv_bn(next(keys), 7, 3, 64, cout_pad=stem_pad)
    cfg = [(64, 3, 1), (128, 4, 2), (256, 23, 2), (512, 3, 2)]   # ResNet-101
    in_log, in_pad = 64, stem_pad
    stages = []
    for width, nblocks, stride in cfg:
        w_pad = _pad_ch(width)
        blocks = []
        for bidx in range(nblocks):
            s = stride if bidx == 0 else 1
            out_log = width * 4
            blk = {
                "stride": s,
                "conv1": _init_conv_bn(next(keys), 1, in_log, width,
                                       cin_pad=in_pad, cout_pad=w_pad),
                "conv2": _init_conv_bn(next(keys), 3, width, width,
                                       cin_pad=w_pad, cout_pad=w_pad),
                "conv3": _init_conv_bn(next(keys), 1, width, out_log,
                                       cin_pad=w_pad, cout_pad=out_log, gamma_scale=0.2),
            }
            if s != 1 or in_log != out_log:
                blk["downsample"] = _init_conv_bn(next(keys), 1, in_log, out_log,
                                                  cin_pad=in_pad, cout_pad=out_log)
            blocks.append(blk)
            in_log, in_pad = out_log, out_log
        stages.append(blocks)
    params["stages"] = stages
    # Declared in __init__ but unused when caption_model == 'transformer':
    params["linear_w"] = jax.random.normal(next(keys), (2048, EMBED_SIZE), jnp.float32) * 0.02
    params["linear_b"] = jnp.zeros((EMBED_SIZE,), jnp.float32)
    return params


def _bottleneck(x, block):
    stride = block["stride"]
    out = conv_bn(x, block["conv1"], stride=1, relu=True)
    out = conv_bn(out, block["conv2"], stride=stride, relu=True)
    if "downsample" in block:
        identity = conv_bn(x, block["downsample"], stride=stride, relu=False)
    else:
        identity = x
    # conv3 + folded-BN + residual add + ReLU fused in one Pallas kernel
    return conv_bn(out, block["conv3"], stride=1, relu=True, residual=identity)


def _resnet_trunk(x, params):
    x = conv_bn(x, params["stem"], stride=2, relu=True)   # 7x7/2 conv + BN + ReLU
    x = _maxpool_3x3_s2(x)                                 # 3x3/2 maxpool
    for stage in params["stages"]:
        for block in stage:
            x = _bottleneck(x, block)
    return x                                               # [B, H/32, W/32, 2048] bf16


def resnet_feats_forward(images_nchw, params, att_size=ATT_SIZE):
    """ResNetFeats.forward, caption_model='transformer', finetune_cnn=False."""
    x = jnp.transpose(images_nchw, (0, 2, 3, 1)).astype(jnp.bfloat16)  # NCHW -> NHWC, bf16 trunk
    x = _resnet_trunk(x, params)                            # with torch.no_grad(): self.resnet(images)
    # adaptive_pool7x7 -> squeeze -> (unsqueeze if B==1) -> permute(0,2,3,1) -> view(B,-1,C)
    att = _adaptive_avgpool_tokens(x, att_size=att_size)
    return att                                              # [B, att*att, 2048] f32


# ------------------------------- main ----------------------------------------

if __name__ == "__main__":
    root = jax.random.PRNGKey(0)
    pkey, xkey = jax.random.split(root)
    params = build_resnet101_params(pkey)
    images = jax.random.normal(xkey, (2, 3, 128, 128), jnp.float32)  # NCHW, like PyTorch
    att = resnet_feats_forward(images, params)
    att = jax.block_until_ready(att)
    assert att.shape == (2, ATT_SIZE * ATT_SIZE, 2048), att.shape
    assert att.dtype == jnp.float32
    assert bool(jnp.all(jnp.isfinite(att)))
    print("KERNEL_OK")
</pallas_src>

<mosaic_0001>
module attributes {stable_mosaic.version = 11 : i64} {
  func.func @_conv_kernel(%arg0: i32, %arg1: i32, %arg2: memref<512x147xbf16, #tpu.memory_space<vmem>>, %arg3: memref<1x147x128xbf16, #tpu.memory_space<vmem>>, %arg4: memref<1x128xf32, #tpu.memory_space<vmem>>, %arg5: memref<512x128xbf16, #tpu.memory_space<vmem>>) attributes {dimension_semantics = [#tpu.dimension_semantics<parallel>, #tpu.dimension_semantics<parallel>], iteration_bounds = array<i64: 16, 1>, scalar_prefetch = 0 : i64, scratch_operands = 0 : i64, tpu.core_type = #tpu.core_type<tc>, window_params = [{transform_indices = @transform_0, window_bounds = array<i64: 512, 147>}, {transform_indices = @transform_1, window_bounds = array<i64: 1, 147, 128>}, {transform_indices = @transform_2, window_bounds = array<i64: 1, 128>}, {transform_indices = @transform_3, window_bounds = array<i64: 512, 128>}]} {
    %c0 = arith.constant 0 : index
    %c0_0 = arith.constant 0 : index
    %0 = vector.load %arg2[%c0, %c0_0] : memref<512x147xbf16, #tpu.memory_space<vmem>>, vector<512x147xbf16>
    %c0_1 = arith.constant 0 : index
    %c0_2 = arith.constant 0 : index
    %c0_3 = arith.constant 0 : index
    %1 = vector.load %arg3[%c0_1, %c0_2, %c0_3] : memref<1x147x128xbf16, #tpu.memory_space<vmem>>, vector<1x147x128xbf16>
    %2 = vector.shape_cast %1 : vector<1x147x128xbf16> to vector<147x128xbf16>
    %cst = arith.constant dense<0.000000e+00> : vector<512x128xf32>
    %3 = tpu.matmul %0, %2, %cst {dimension_numbers = #tpu.dot_dimension_numbers<[1], [0], [0], [1], [0, 0, 1, 1], [], []>} : vector<512x147xbf16>, vector<147x128xbf16>, vector<512x128xf32> -> vector<512x128xf32>
    %c0_4 = arith.constant 0 : index
    %c0_5 = arith.constant 0 : index
    %4 = vector.load %arg4[%c0_4, %c0_5] : memref<1x128xf32, #tpu.memory_space<vmem>>, vector<1x128xf32>
    %5 = vector.broadcast %4 : vector<1x128xf32> to vector<512x128xf32>
    %6 = arith.addf %3, %5 : vector<512x128xf32>
    %cst_6 = arith.constant 0.000000e+00 : f32
    %7 = vector.broadcast %cst_6 : f32 to vector<512x128xf32>
    %8 = arith.maximumf %6, %7 : vector<512x128xf32>
    %9 = arith.truncf %8 : vector<512x128xf32> to vector<512x128xbf16>
    %c0_7 = arith.constant 0 : index
    %c0_8 = arith.constant 0 : index
    %10 = vector.load %arg5[%c0_7, %c0_8] : memref<512x128xbf16, #tpu.memory_space<vmem>>, vector<512x128xbf16>
    tpu.vector_store %arg5[%c0_7, %c0_8], %9 {strides = array<i32>} : memref<512x128xbf16, #tpu.memory_space<vmem>>, vector<512x128xbf16>,
    return
  }
  func.func @transform_0(%arg0: i32, %arg1: i32) -> (i32, i32) {
    %c0_i32 = arith.constant 0 : i32
    %c0_i32_0 = arith.constant 0 : i32
    return %arg0, %c0_i32 : i32, i32
  }
  func.func @transform_1(%arg0: i32, %arg1: i32) -> (i32, i32, i32) {
    %c0_i32 = arith.constant 0 : i32
    %c0_i32_0 = arith.constant 0 : i32
    %c0_i32_1 = arith.constant 0 : i32
    return %c0_i32, %c0_i32_0, %arg1 : i32, i32, i32
  }
  func.func @transform_2(%arg0: i32, %arg1: i32) -> (i32, i32) {
    %c0_i32 = arith.constant 0 : i32
    %c0_i32_0 = arith.constant 0 : i32
    return %c0_i32, %arg1 : i32, i32
  }
  func.func @transform_3(%arg0: i32, %arg1: i32) -> (i32, i32) {
    %c0_i32 = arith.constant 0 : i32
    return %arg0, %arg1 : i32, i32
  }
}

</mosaic_0001>

<bundles_post_ra>
// kernel: _conv_bn_jit.1
= control target key start
LH: loop header
LB: loop body
LE: loop exit
PB: predicated region body
PF: predicated region fallthrough
CT: control target
= control target key end

     0   :  { %8 = vsyncpa [#allocation3], 0  ;;  %s2739_s0 = inlined_call_operand.vmem [shape: bf16[8192,147], index: 0, kind: input, shape index: {}]   ;;  %s2740_s1 = inlined_call_operand.vmem [shape: bf16[1,147,128], index: 1, kind: input, shape index: {}]   ;;  %s2741_s2 = inlined_call_operand.hbm [shape: f32[1,128], index: 2, kind: input, shape index: {}]   ;;  %s2742_s3 = inlined_call_operand.hbm [shape: bf16[8192,128], index: 3, kind: output, shape index: {}]  }
   0x1   :  { %9 = vsyncpa [#allocation4], 0 }
   0x2   :  { %11 = vsyncpa [#allocation4 + $0x1], 0  ;;  %s2334_s12 = smov 0   ;;  %s2336_s13 = smov 0  }
   0x3   :  { %s2338_s14 = smov 0   ;;  %s2340_s15 = smov 0  }
   0x4   :  { %s2342_s16 = smov 0   ;;  %s2344_s17 = smov 0  }
   0x5 LB: > { %s1555_s18 = sadd.s32 4294967295, %s2306_s17   ;;  %s1556_s19 = sadd.s32 4294967294, %s2306_s17   ;;  %s2306_s17 = sphi %s2344_s17, %s17_s17   ;;  %s2302_s16 = sphi %s2342_s16, %s2760_s16   ;;  %s2298_s15 = sphi %s2340_s15, %s2759_s15   ;;  %s2294_s14 = sphi %s2338_s14, %s2758_s14   ;;  %s2290_s13 = sphi %s2336_s13, %s2757_s13   ;;  %s2286_s12 = sphi %s2334_s12, %s2756_s12  }
   0x6   : > { %s29_s20 = sadd.s32 1, %s2302_s16  ;;  %s116_s21 = sadd.s32 1, %s2294_s14 }
   0x7   : > { %p31_p0 = scmp.ge.s32.totalorder %s29_s20, 16  ;;  %p126_p1 = scmp.ne.s32.totalorder %s2294_s14, %s2290_s13 }
   0x8   : > { %p127_p2 = scmp.eq.s32.totalorder %s1555_s18, 15  ;;  %p132_p3 = scmp.ne.s32.totalorder %s2290_s13, %s2286_s12 }
   0x9   : > { %s2762_s20 = smov (%p31_p0, %s29_s20), 0  ;;  %p133_p5 = scmp.eq.s32.totalorder %s1556_s19, 15 }
   0xa   : > { %p2374_p4 = por %p127_p2, %p126_p1  ;;  %s111_s23 = ssub.s32 %s2302_s16, %s2762_s20 }
   0xb   : > { %p1557_p6 = scmp.ge.s32.totalorder %s2306_s17, 1  ;;  %p114_p7 = scmp.eq.s32.totalorder %s111_s23, 0 }
   0xc   : > { %s2747_s22 = scalar_select %p2374_p4, 1, 0 }
   0xd   : > { %p2381_p8 = por %p133_p5, %p132_p3  ;;  %p140_p9 = scmp.lt.s32.totalorder %s2306_s17, 17 }
   0xe   : > { %s2387_s25 = scalar_select %p114_p7, %s2294_s14, %s116_s21  }
   0xf   : > { %s2748_s24 = scalar_select %p2381_p8, 1, 0 }
  0x10   : > { %p2389_p10 = pnand %p1557_p6, %p140_p9  ;;  %p2393_p11 = scmp.eq.s32.totalorder %s1555_s18, 0 }
  0x11   : > { %s2308_s28 = smov [#allocation2]   ;;  %s2196_s6 = scalar_lea.hbm %s2741_s2, 16 }
  0x12   : > { %s2749_s26 = scalar_select %p2389_p10, 1, 0 }
  0x13   : > { %s2750_s27 = scalar_select %p2393_p11, 1, 0 }
  0x14   : > { %p2026_p12 = pneg %p2389_p10  ;;  %s162_s29 = sshll.u32 %s2308_s28, 4  ;;  %s163_s29 = int_to_ptr.vmem [resolvable:$true] %s162_s29 }
  0x15   : > { %p2197_p0 = scmp.ne.s32.totalorder %s2741_s2, %s2196_s6  ;;  %p2203_p5 = scmp.lt.u32.totalorder %s2196_s6, %s2741_s2 }
  0x16   : > { %p2401_p13 = pnand %p2393_p11, %p2026_p12 }
  0x18   : > { %p2198_p1 = pneg %p2401_p13 }
  0x1a   : > { %p2199_p2 = pnand %p2198_p1, %p2197_p0 }
  0x1c   : > { %p2200_p3 = pneg %p2199_p2 }
  0x1e   : > { %p2205_p6 = pnand %p2203_p5, %p2200_p3 }
  0x20   : > { %2208 = shalt.err (!%p2205_p6)
}
  0x21   : > { %s2209_s11 = scalar_lea.vmem %s163_s29, 16  ;;  %s2216_s18 = scalar_lea.vmem %s163_s29, 32 }
  0x22   : > { %p2210_p7 = scmp.ne.s32.totalorder %s163_s29, %s2209_s11  ;;  %p2217_p8 = scmp.lt.s32.totalorder %s163_s29, %s163_s29 }
  0x23   : > { %p2218_p4 = scmp.lt.s32.totalorder %s2216_s18, %s2209_s11 }
  0x24   : > { %p2212_p9 = pnand %p2210_p7, %p2198_p1 }
  0x25   : > { %p2219_p11 = por %p2218_p4, %p2217_p8 }
  0x26   : > { %p2213_p12 = pneg %p2212_p9 }
  0x28   : > { %p2220_p10 = pnand %p2219_p11, %p2213_p12 }
  0x2a   : > { %2223 = shalt.err (!%p2220_p10)
}
  0x2b   : > { %2029 = dma.hbm_to_vmem [thread:$0]  (!%p2401_p13), %s2741_s2, 16, %s163_s29, [#allocation3]  }
  0x2c   : > { %p2752_p0 = scmp.ne.s32.totalorder %s2749_s26, 0 }
  0x2d   : > { %p2753_p2 = scmp.ne.s32.totalorder (!%p2752_p0), %s2750_s27, 0 }
  0x2e   : > { %185 = sbr.rel (%p2752_p0) target bundleno = 450 (0x1c2), region = 32 }
  0x35   : > { %2277 = dma.done.wait (%p2753_p2), [#allocation3], 16  }
  0x36   : > { %2279 = vsyncadd (%p2753_p2), [#allocation3], 4294967280  ;;  %v2309_v0 = vmov 0   ;;  %s1564_s23 = sshll.u32 %s2298_s15, 6  ;;  %v2090_v1 = vld [vmem:[%s2740_s1] sm:$0xff]   ;;  %v2091_v2 = vld [vmem:[%s2740_s1 + $0x8] sm:$0xff]  }
  0x37   : > { %766 = vmatprep.subr.bf16.mxu0 %v2309_v0  ;;  %2000 = vmatprep.subr.bf16.mxu1 %v2309_v0  ;;  %p215_p4 = scmp.lt.s32.totalorder %s1564_s23, 1023  ;;  %v2092_v3 = vld [vmem:[%s2740_s1 + $0x10] sm:$0xff]   ;;  %vm662_vm0 = vcmask 154624   ;;  %v2093_v4 = vld [vmem:[%s2740_s1 + $0x18] sm:$0xff]   ;;  %v2094_v7 = vld [vmem:[%s2740_s1 + $0x20] sm:$0xff]   ;;  %vm759_vm1 = vcmask 1040384  }
  0x38   : > { %767 = vmatpush1.bf16.msra.mxu0 %v2090_v1  ;;  %2010 = vmatpush1.bf16.msra.mxu1 %v2090_v1  ;;  %v2095_v8 = vld [vmem:[%s2740_s1 + $0x28] sm:$0xff]   ;;  %v2096_v9 = vld [vmem:[%s2740_s1 + $0x30] sm:$0xff]   ;;  %v2097_v10 = vld [vmem:[%s2740_s1 + $0x38] sm:$0xff]   ;;  %vm760_vm2 = vcmask 1041408   ;;  %v2310_v11 = vmov 65535   ;;  %s211_s6 = sand.u32 1, %s2290_s13  }
  0x39   : > { %s2764_s23 = smov (!%p215_p4, %s1564_s23), 1023  ;;  %768 = vmatprep.subr.bf16.mxu0 %v2309_v0  ;;  %2001 = vmatprep.subr.bf16.mxu1 %v2309_v0  ;;  %v761_v12 = vsel %vm759_vm1, 4294967295, %v2310_v11  ;;  %v2098_v13 = vld [vmem:[%s2740_s1 + $0x40] sm:$0xff]   ;;  %v2099_v14 = vld [vmem:[%s2740_s1 + $0x48] ss:$0 sps:$4 sm:$0x33]  }
  0x3a   : > { %s1743_s27 = sshll.u32 %s2764_s23, 3  ;;  %v762_v15 = vsel %vm760_vm2, %v761_v12, 0  ;;  %s1563_s7 = sshll.u32 %s211_s6, 8 }
  0x3b   : > { %s2446_s8 = scalar_lea.vmem %s2739_s0, %s1743_s27  ;;  %v764_v16 = vand.u32 %v2099_v14, %v762_v15  ;;  %v2579_v15 = vld [vmem:[#allocation2] ss:$0 sm:$0xff]  ;;  %s1808_s9 = sshll.u32 %s2298_s15, 12 }
  0x3c   : > { %769 = vmatpush1.bf16.msra.mxu0 %v2091_v2  ;;  %2011 = vmatpush1.bf16.msra.mxu1 %v2091_v2  ;;  %v2102_v5 = vld [vmem:[%s2446_s8 + $0x4] ss:$8 sps:$4 sm:$0xff]   ;;  %v2100_v17 = vld [vmem:[%s2446_s8] ss:$8 sps:$4 sm:$0xff]   ;;  %v2106_v19 = vld [vmem:[%s2446_s8 + $0x14] ss:$8 sps:$4 sm:$0xff]   ;;  %s2685_s19 = scalar_lea.hbm %s2742_s3, %s1808_s9 }
  0x3d   : > { %770 = vmatprep.subr.bf16.mxu0 %v2309_v0  ;;  %2002 = vmatprep.subr.bf16.mxu1 %v2309_v0  ;;  %v2105_v6 = vld [vmem:[%s2446_s8 + $0x104] ss:$8 sps:$4 sm:$0xff]   ;;  %v2103_v18 = vld [vmem:[%s2446_s8 + $0x100] ss:$8 sps:$4 sm:$0xff]   ;;  %v2108_v20 = vld [vmem:[%s2446_s8 + $0x114] ss:$8 sps:$4 sm:$0xff]  }
  0x3e   : > { %1642 = vmatprep.mubr.msk.bf16.mxu0 %vm662_vm0, %v2102_v5  ;;  %1658 = vmatprep.mubr.msk.bf16.mxu1 %vm662_vm0, %v2105_v6  ;;  %v2110_v21 = vld [vmem:[%s2446_s8 + $0x10] ss:$8 sps:$4 sm:$0xff]   ;;  %v2112_v23 = vld [vmem:[%s2446_s8 + $0x24] ss:$8 sps:$4 sm:$0xff]   ;;  %v2116_v25 = vld [vmem:[%s2446_s8 + $0x20] ss:$8 sps:$4 sm:$0xff]  }
  0x3f   : > { %v2111_v22 = vld [vmem:[%s2446_s8 + $0x110] ss:$8 sps:$4 sm:$0xff]   ;;  %v2114_v24 = vld [vmem:[%s2446_s8 + $0x124] ss:$8 sps:$4 sm:$0xff]   ;;  %v2117_v26 = vld [vmem:[%s2446_s8 + $0x120] ss:$8 sps:$4 sm:$0xff]  }
  0x40   : > { %771 = vmatpush1.bf16.msra.mxu0 %v2092_v3  ;;  %2012 = vmatpush1.bf16.msra.mxu1 %v2092_v3  ;;  %v2118_v27 = vld [vmem:[%s2446_s8 + $0x34] ss:$8 sps:$4 sm:$0xff]   ;;  %v2122_v29 = vld [vmem:[%s2446_s8 + $0x30] ss:$8 sps:$4 sm:$0xff]   ;;  %v2124_v31 = vld [vmem:[%s2446_s8 + $0x44] ss:$8 sps:$4 sm:$0xff]  }
  0x41   : > { %772 = vmatprep.subr.bf16.mxu0 %v2309_v0  ;;  %2003 = vmatprep.subr.bf16.mxu1 %v2309_v0  ;;  %v2120_v28 = vld [vmem:[%s2446_s8 + $0x134] ss:$8 sps:$4 sm:$0xff]   ;;  %v2123_v30 = vld [vmem:[%s2446_s8 + $0x130] ss:$8 sps:$4 sm:$0xff]   ;;  %v2126_v32 = vld [vmem:[%s2446_s8 + $0x144] ss:$8 sps:$4 sm:$0xff]  }
  0x42   : > { %v2128_v33 = vld [vmem:[%s2446_s8 + $0x40] ss:$8 sps:$4 sm:$0xff]   ;;  %v2130_v35 = vld [vmem:[%s2446_s8 + $0x54] ss:$8 sps:$4 sm:$0xff]   ;;  %v2134_v37 = vld [vmem:[%s2446_s8 + $0x50] ss:$8 sps:$4 sm:$0xff]  }
  0x43   : > { %v2129_v34 = vld [vmem:[%s2446_s8 + $0x140] ss:$8 sps:$4 sm:$0xff]   ;;  %v2132_v36 = vld [vmem:[%s2446_s8 + $0x154] ss:$8 sps:$4 sm:$0xff]   ;;  %v2135_v38 = vld [vmem:[%s2446_s8 + $0x150] ss:$8 sps:$4 sm:$0xff]  }
  0x44   : > { %773 = vmatpush1.bf16.msra.mxu0 %v2093_v4  ;;  %2013 = vmatpush1.bf16.msra.mxu1 %v2093_v4  ;;  %v2136_v39 = vld [vmem:[%s2446_s8 + $0x64] ss:$8 sps:$4 sm:$0xff]   ;;  %v2140_v41 = vld [vmem:[%s2446_s8 + $0x60] ss:$8 sps:$4 sm:$0xff]   ;;  %v2142_v43 = vld [vmem:[%s2446_s8 + $0x74] ss:$8 sps:$4 sm:$0xff]  }
  0x45   : > { %774 = vmatprep.subr.bf16.mxu0 %v2309_v0  ;;  %2004 = vmatprep.subr.bf16.mxu1 %v2309_v0  ;;  %v2138_v40 = vld [vmem:[%s2446_s8 + $0x164] ss:$8 sps:$4 sm:$0xff]   ;;  %v2141_v42 = vld [vmem:[%s2446_s8 + $0x160] ss:$8 sps:$4 sm:$0xff]   ;;  %v2144_v44 = vld [vmem:[%s2446_s8 + $0x174] ss:$8 sps:$4 sm:$0xff]  }
  0x46   : > { %v2146_v45 = vld [vmem:[%s2446_s8 + $0x70] ss:$8 sps:$4 sm:$0xff]   ;;  %v2148_v47 = vld [vmem:[%s2446_s8 + $0x84] ss:$8 sps:$4 sm:$0xff]   ;;  %v2152_v49 = vld [vmem:[%s2446_s8 + $0x80] ss:$8 sps:$4 sm:$0xff]  }
  0x47   : > { %v2147_v46 = vld [vmem:[%s2446_s8 + $0x170] ss:$8 sps:$4 sm:$0xff]   ;;  %v2150_v48 = vld [vmem:[%s2446_s8 + $0x184] ss:$8 sps:$4 sm:$0xff]   ;;  %v2153_v50 = vld [vmem:[%s2446_s8 + $0x180] ss:$8 sps:$4 sm:$0xff]  }
  0x48   : > { %775 = vmatpush1.bf16.msra.mxu0 %v2094_v7  ;;  %2014 = vmatpush1.bf16.msra.mxu1 %v2094_v7  ;;  %v2154_v51 = vld [vmem:[%s2446_s8 + $0x94] ss:$8 sps:$4 sm:$0xff]   ;;  %v2158_v53 = vld [vmem:[%s2446_s8 + $0x90] ss:$8 sps:$4 sm:$0xff]   ;;  %v2160_v55 = vld [vmem:[%s2446_s8 + $0xa4] ss:$8 sps:$4 sm:$0xff]  }
  0x49   : > { %776 = vmatprep.subr.bf16.mxu0 %v2309_v0  ;;  %2005 = vmatprep.subr.bf16.mxu1 %v2309_v0  ;;  %v2156_v52 = vld [vmem:[%s2446_s8 + $0x194] ss:$8 sps:$4 sm:$0xff]   ;;  %v2159_v54 = vld [vmem:[%s2446_s8 + $0x190] ss:$8 sps:$4 sm:$0xff]   ;;  %v2162_v56 = vld [vmem:[%s2446_s8 + $0x1a4] ss:$8 sps:$4 sm:$0xff]  }
  0x4a   : > { %v2164_v57 = vld [vmem:[%s2446_s8 + $0xa0] ss:$8 sps:$4 sm:$0xff]   ;;  %v2166_v59 = vld [vmem:[%s2446_s8 + $0xb4] ss:$8 sps:$4 sm:$0xff]   ;;  %v2170_v61 = vld [vmem:[%s2446_s8 + $0xb0] ss:$8 sps:$4 sm:$0xff]  }
  0x4b   : > { %v2165_v58 = vld [vmem:[%s2446_s8 + $0x1a0] ss:$8 sps:$4 sm:$0xff]   ;;  %v2168_v60 = vld [vmem:[%s2446_s8 + $0x1b4] ss:$8 sps:$4 sm:$0xff]   ;;  %v2171_v62 = vld [vmem:[%s2446_s8 + $0x1b0] ss:$8 sps:$4 sm:$0xff]  }
  0x4c   : > { %777 = vmatpush1.bf16.msra.mxu0 %v2095_v8  ;;  %2015 = vmatpush1.bf16.msra.mxu1 %v2095_v8  ;;  %v2172_v63 = vld [vmem:[%s2446_s8 + $0xc4] ss:$8 sps:$4 sm:$0xff]   ;;  %v2176_v1 = vld [vmem:[%s2446_s8 + $0xc0] ss:$8 sps:$4 sm:$0xff]   ;;  %v2178_v3 = vld [vmem:[%s2446_s8 + $0xd4] ss:$8 sps:$4 sm:$0xff]  }
  0x4d   : > { %778 = vmatprep.subr.bf16.mxu0 %v2309_v0  ;;  %2006 = vmatprep.subr.bf16.mxu1 %v2309_v0  ;;  %v2177_v2 = vld [vmem:[%s2446_s8 + $0x1c0] ss:$8 sps:$4 sm:$0xff]   ;;  %v2180_v4 = vld [vmem:[%s2446_s8 + $0x1d4] ss:$8 sps:$4 sm:$0xff]   ;;  %v2182_v5 = vld [vmem:[%s2446_s8 + $0xd0] ss:$8 sps:$4 sm:$0xff]  }
  0x4e   : > { %v2183_v6 = vld [vmem:[%s2446_s8 + $0x1d0] ss:$8 sps:$4 sm:$0xff]   ;;  %v2184_v7 = vld [vmem:[%s2446_s8 + $0xe4] ss:$8 sps:$4 sm:$0xff]   ;;  %v2190_v11 = vld [vmem:[%s2446_s8 + $0xf4] ss:$8 sps:$4 sm:$0xff]  }
  0x4f   : > { %v2186_v8 = vld [vmem:[%s2446_s8 + $0x1e4] ss:$8 sps:$4 sm:$0xff]   ;;  %v2192_v12 = vld [vmem:[%s2446_s8 + $0x1f4] ss:$8 sps:$4 sm:$0xff]   ;;  %v2195_v14 = vld [vmem:[%s2446_s8 + $0x1f0] ss:$8 sps:$4 sm:$0xff]  }
  0x50   : > { %779 = vmatpush1.bf16.msra.mxu0 %v2096_v9  ;;  %2016 = vmatpush1.bf16.msra.mxu1 %v2096_v9  ;;  %v2188_v9 = vld [vmem:[%s2446_s8 + $0xe0] ss:$8 sps:$4 sm:$0xff]   ;;  %s2693_s15 = scalar_lea.sflag [#allocation4], %s211_s6  ;;  %p2754_p10 = scmp.ne.s32.totalorder %s2747_s22, 0 }
  0x51   : > { %780 = vmatprep.subr.bf16.mxu0 %v2309_v0  ;;  %2007 = vmatprep.subr.bf16.mxu1 %v2309_v0  ;;  %s2311_s23 = smov [#allocation5]  }
  0x52   : > { %s2228_s28 = sshll.u32 %s2311_s23, 4  ;;  %s2229_s28 = int_to_ptr.vmem [resolvable:$false] %s2228_s28 }
  0x53   : > { %s2230_s30 = scalar_lea.vmem %s2229_s28, 8192 }
  0x54   : > { %781 = vmatpush1.bf16.msra.mxu0 %v2097_v10  ;;  %2017 = vmatpush1.bf16.msra.mxu1 %v2097_v10  ;;  %v2189_v10 = vld [vmem:[%s2446_s8 + $0x1e0] ss:$8 sps:$4 sm:$0xff]  }
  0x55   : > { %782 = vmatprep.subr.bf16.mxu0 %v2309_v0  ;;  %2008 = vmatprep.subr.bf16.mxu1 %v2309_v0 }
  0x58   : > { %783 = vmatpush1.bf16.msra.mxu0 %v2098_v13  ;;  %2018 = vmatpush1.bf16.msra.mxu1 %v2098_v13  ;;  %v2194_v13 = vld [vmem:[%s2446_s8 + $0xf0] ss:$8 sps:$4 sm:$0xff]  }
  0x59   : > { %784 = vmatprep.subr.bf16.mxu0 %v2309_v0  ;;  %2009 = vmatprep.subr.bf16.mxu1 %v2309_v0  ;;  %v2174_v0 = vld [vmem:[%s2446_s8 + $0x1c4] ss:$8 sps:$4 sm:$0xff]   ;;  %s2588_s8 = scalar_lea.vmem [#allocation5], %s1563_s7 }
  0x5a   : > { %s1454_s10 = sshll.u32 %s2588_s8, 4  ;;  %s2687_s10 = int_to_ptr.vmem [resolvable:$true] %s1454_s10 }
  0x5b   : > { %s2224_s21 = scalar_lea.vmem %s2687_s10, 4096  ;;  %p2231_p1 = scmp.lt.s32.totalorder %s2687_s10, %s2229_s28 }
  0x5c   : > { %785 = vmatpush1.bf16.msra.mxu0 %v764_v16  ;;  %2019 = vmatpush1.bf16.msra.mxu1 %v764_v16  ;;  %p2225_p8 = scmp.ne.s32.totalorder %s2687_s10, %s2224_s21  ;;  %p2232_p3 = scmp.lt.s32.totalorder %s2230_s30, %s2224_s21 }
  0x5e   : > { %p2226_p11 = pnand %p2225_p8, %p2754_p10  ;;  %p2233_p5 = por %p2232_p3, %p2231_p1 }
  0x5f   : > { %799 = vmatmul.mubr.bf16.vlgmr.msra.gmra.mrb[0].mxu0 %v2100_v17  ;;  %927 = vmatmul.mubr.bf16.vlgmr.msra.gmra.mrb[0].mxu1 %v2103_v18 }
  0x60   : > { %1643 = vmatprep.mubr.msk.bf16.mxu0 %vm662_vm0, %v2106_v19  ;;  %1659 = vmatprep.mubr.msk.bf16.mxu1 %vm662_vm0, %v2108_v20  ;;  %p2227_p13 = pneg %p2226_p11 }
  0x62   : > { %p2234_p6 = pnand %p2233_p5, %p2227_p13 }
  0x67   : > { %807 = vmatmul.mubr.bf16.gmra.mrb[4].mxu0 %v2110_v21  ;;  %935 = vmatmul.mubr.bf16.gmra.mrb[4].mxu1 %v2111_v22 }
  0x68   : > { %1644 = vmatprep.mubr.msk.bf16.mxu0 %vm662_vm0, %v2112_v23  ;;  %1660 = vmatprep.mubr.msk.bf16.mxu1 %vm662_vm0, %v2114_v24 }
  0x6f   : > { %815 = vmatmul.mubr.bf16.gmra.mrb[8].mxu0 %v2116_v25  ;;  %943 = vmatmul.mubr.bf16.gmra.mrb[8].mxu1 %v2117_v26 }
  0x70   : > { %1645 = vmatprep.mubr.msk.bf16.mxu0 %vm662_vm0, %v2118_v27  ;;  %1661 = vmatprep.mubr.msk.bf16.mxu1 %vm662_vm0, %v2120_v28 }
  0x77   : > { %823 = vmatmul.mubr.bf16.gmra.mrb[12].mxu0 %v2122_v29  ;;  %951 = vmatmul.mubr.bf16.gmra.mrb[12].mxu1 %v2123_v30 }
  0x78   : > { %1646 = vmatprep.mubr.msk.bf16.mxu0 %vm662_vm0, %v2124_v31  ;;  %1662 = vmatprep.mubr.msk.bf16.mxu1 %vm662_vm0, %v2126_v32 }
  0x7f   : > { %831 = vmatmul.mubr.bf16.gmra.mrb[16].mxu0 %v2128_v33  ;;  %959 = vmatmul.mubr.bf16.gmra.mrb[16].mxu1 %v2129_v34 }
  0x80   : > { %1647 = vmatprep.mubr.msk.bf16.mxu0 %vm662_vm0, %v2130_v35  ;;  %1663 = vmatprep.mubr.msk.bf16.mxu1 %vm662_vm0, %v2132_v36 }
  0x87   : > { %839 = vmatmul.mubr.bf16.gmra.mrb[20].mxu0 %v2134_v37  ;;  %967 = vmatmul.mubr.bf16.gmra.mrb[20].mxu1 %v2135_v38 }
  0x88   : > { %1648 = vmatprep.mubr.msk.bf16.mxu0 %vm662_vm0, %v2136_v39  ;;  %1664 = vmatprep.mubr.msk.bf16.mxu1 %vm662_vm0, %v2138_v40 }
  0x8f   : > { %847 = vmatmul.mubr.bf16.gmra.mrb[24].mxu0 %v2140_v41  ;;  %975 = vmatmul.mubr.bf16.gmra.mrb[24].mxu1 %v2141_v42 }
  0x90   : > { %1649 = vmatprep.mubr.msk.bf16.mxu0 %vm662_vm0, %v2142_v43  ;;  %1665 = vmatprep.mubr.msk.bf16.mxu1 %vm662_vm0, %v2144_v44 }
  0x97   : > { %855 = vmatmul.mubr.bf16.gmra.mrb[28].mxu0 %v2146_v45  ;;  %983 = vmatmul.mubr.bf16.gmra.mrb[28].mxu1 %v2147_v46 }
  0x98   : > { %1650 = vmatprep.mubr.msk.bf16.mxu0 %vm662_vm0, %v2148_v47  ;;  %1666 = vmatprep.mubr.msk.bf16.mxu1 %vm662_vm0, %v2150_v48 }
  0x9f   : > { %863 = vmatmul.mubr.bf16.gmra.mrb[32].mxu0 %v2152_v49  ;;  %991 = vmatmul.mubr.bf16.gmra.mrb[32].mxu1 %v2153_v50 }
  0xa0   : > { %1651 = vmatprep.mubr.msk.bf16.mxu0 %vm662_vm0, %v2154_v51  ;;  %1667 = vmatprep.mubr.msk.bf16.mxu1 %vm662_vm0, %v2156_v52 }
  0xa7   : > { %871 = vmatmul.mubr.bf16.gmra.mrb[36].mxu0 %v2158_v53  ;;  %999 = vmatmul.mubr.bf16.gmra.mrb[36].mxu1 %v2159_v54 }
  0xa8   : > { %1652 = vmatprep.mubr.msk.bf16.mxu0 %vm662_vm0, %v2160_v55  ;;  %1668 = vmatprep.mubr.msk.bf16.mxu1 %vm662_vm0, %v2162_v56 }
  0xaf   : > { %879 = vmatmul.mubr.bf16.gmra.mrb[40].mxu0 %v2164_v57  ;;  %1007 = vmatmul.mubr.bf16.gmra.mrb[40].mxu1 %v2165_v58 }
  0xb0   : > { %1653 = vmatprep.mubr.msk.bf16.mxu0 %vm662_vm0, %v2166_v59  ;;  %1669 = vmatprep.mubr.msk.bf16.mxu1 %vm662_vm0, %v2168_v60 }
  0xb7   : > { %887 = vmatmul.mubr.bf16.gmra.mrb[44].mxu0 %v2170_v61  ;;  %1015 = vmatmul.mubr.bf16.gmra.mrb[44].mxu1 %v2171_v62 }
  0xb8   : > { %1654 = vmatprep.mubr.msk.bf16.mxu0 %vm662_vm0, %v2172_v63  ;;  %1670 = vmatprep.mubr.msk.bf16.mxu1 %vm662_vm0, %v2174_v0 }
  0xbf   : > { %895 = vmatmul.mubr.bf16.gmra.mrb[48].mxu0 %v2176_v1  ;;  %1023 = vmatmul.mubr.bf16.gmra.mrb[48].mxu1 %v2177_v2 }
  0xc0   : > { %1655 = vmatprep.mubr.msk.bf16.mxu0 %vm662_vm0, %v2178_v3  ;;  %1671 = vmatprep.mubr.msk.bf16.mxu1 %vm662_vm0, %v2180_v4 }
  0xc7   : > { %903 = vmatmul.mubr.bf16.gmra.mrb[52].mxu0 %v2182_v5  ;;  %1031 = vmatmul.mubr.bf16.gmra.mrb[52].mxu1 %v2183_v6 }
  0xc8   : > { %1656 = vmatprep.mubr.msk.bf16.mxu0 %vm662_vm0, %v2184_v7  ;;  %1672 = vmatprep.mubr.msk.bf16.mxu1 %vm662_vm0, %v2186_v8 }
  0xcf   : > { %911 = vmatmul.mubr.bf16.gmra.mrb[56].mxu0 %v2188_v9  ;;  %1039 = vmatmul.mubr.bf16.gmra.mrb[56].mxu1 %v2189_v10 }
  0xd0   : > { %1657 = vmatprep.mubr.msk.bf16.mxu0 %vm662_vm0, %v2190_v11  ;;  %1673 = vmatprep.mubr.msk.bf16.mxu1 %vm662_vm0, %v2192_v12 }
  0xd7   : > { %919 = vmatmul.mubr.bf16.gmra.mrb[60].mxu0 %v2194_v13  ;;  %1047 = vmatmul.mubr.bf16.gmra.mrb[60].mxu1 %v2195_v14 }
 0x132   : > { %v800_v16 = vpop.f32.mrb[0].mxu0  ;;  %v928_v17 = vpop.f32.mrb[0].mxu1 }
 0x133   : > { %v801_v18 = vadd.f32 %v2579_v15, %v800_v16  ;;  %v929_v19 = vadd.f32 %v2579_v15, %v928_v17  ;;  %v802_v20 = vpop.f32.mrb[1].mxu0  ;;  %v930_v21 = vpop.f32.mrb[1].mxu1 }
 0x134   : > { %v803_v22 = vpop.f32.mrb[2].mxu0  ;;  %v931_v23 = vpop.f32.mrb[2].mxu1 }
 0x135   : > { %v804_v24 = vadd.f32 %v2579_v15, %v803_v22  ;;  %v932_v25 = vadd.f32 %v2579_v15, %v931_v23  ;;  %v805_v26 = vpop.f32.mrb[3].mxu0  ;;  %v933_v27 = vpop.f32.mrb[3].mxu1  ;;  %v1055_v28 = vmax.f32 %v801_v18, 0.0  ;;  %v1087_v29 = vmax.f32 %v929_v19, 0.0 }
 0x137   : > { %v1056_v30 = vmax.f32 %v804_v24, 0.0  ;;  %v1088_v31 = vmax.f32 %v932_v25, 0.0 }
 0x139   : > { %v1812_v32 = vpack.c.bf16 %v1056_v30, %v1055_v28  ;;  %v1892_v33 = vpack.c.bf16 %v1088_v31, %v1087_v29 }
 0x13a   : > { %v808_v34 = vpop.f32.mrb[4].mxu0  ;;  %v936_v35 = vpop.f32.mrb[4].mxu1 }
 0x13b   : > { %1813 = vst [vmem:[%s2588_s8] sm:$0xff] %v1812_v32   ;;  %1984 = vst [vmem:[%s2588_s8 + $0x80] sm:$0xff] %v1892_v33   ;;  %v809_v36 = vadd.f32 %v2579_v15, %v808_v34  ;;  %v937_v37 = vadd.f32 %v2579_v15, %v936_v35  ;;  %v810_v38 = vpop.f32.mrb[5].mxu0  ;;  %v938_v39 = vpop.f32.mrb[5].mxu1 }
 0x13c   : > { %v811_v40 = vpop.f32.mrb[6].mxu0  ;;  %v939_v41 = vpop.f32.mrb[6].mxu1 }
 0x13d   : > { %v812_v42 = vadd.f32 %v2579_v15, %v811_v40  ;;  %v940_v43 = vadd.f32 %v2579_v15, %v939_v41  ;;  %v813_v44 = vpop.f32.mrb[7].mxu0  ;;  %v941_v45 = vpop.f32.mrb[7].mxu1  ;;  %v1057_v46 = vmax.f32 %v809_v36, 0.0  ;;  %v1089_v47 = vmax.f32 %v937_v37, 0.0 }
 0x13f   : > { %v1058_v48 = vmax.f32 %v812_v42, 0.0  ;;  %v1090_v49 = vmax.f32 %v940_v43, 0.0 }
 0x141   : > { %v1817_v50 = vpack.c.bf16 %v1058_v48, %v1057_v46  ;;  %v1897_v51 = vpack.c.bf16 %v1090_v49, %v1089_v47 }
 0x142   : > { %v816_v52 = vpop.f32.mrb[8].mxu0  ;;  %v944_v53 = vpop.f32.mrb[8].mxu1 }
 0x143   : > { %1969 = vst [vmem:[%s2588_s8 + $0x8] sm:$0xff] %v1817_v50   ;;  %1985 = vst [vmem:[%s2588_s8 + $0x88] sm:$0xff] %v1897_v51   ;;  %v817_v54 = vadd.f32 %v2579_v15, %v816_v52  ;;  %v945_v55 = vadd.f32 %v2579_v15, %v944_v53  ;;  %v818_v56 = vpop.f32.mrb[9].mxu0  ;;  %v946_v57 = vpop.f32.mrb[9].mxu1 }
 0x144   : > { %v819_v58 = vpop.f32.mrb[10].mxu0  ;;  %v947_v59 = vpop.f32.mrb[10].mxu1 }
 0x145   : > { %v820_v60 = vadd.f32 %v2579_v15, %v819_v58  ;;  %v948_v61 = vadd.f32 %v2579_v15, %v947_v59  ;;  %v821_v62 = vpop.f32.mrb[11].mxu0  ;;  %v949_v63 = vpop.f32.mrb[11].mxu1  ;;  %v1059_v0 = vmax.f32 %v817_v54, 0.0  ;;  %v1091_v1 = vmax.f32 %v945_v55, 0.0 }
 0x147   : > { %v1060_v2 = vmax.f32 %v820_v60, 0.0  ;;  %v1092_v3 = vmax.f32 %v948_v61, 0.0 }
 0x149   : > { %v1822_v4 = vpack.c.bf16 %v1060_v2, %v1059_v0  ;;  %v1902_v5 = vpack.c.bf16 %v1092_v3, %v1091_v1 }
 0x14a   : > { %v824_v6 = vpop.f32.mrb[12].mxu0  ;;  %v952_v7 = vpop.f32.mrb[12].mxu1 }
 0x14b   : > { %1970 = vst [vmem:[%s2588_s8 + $0x10] sm:$0xff] %v1822_v4   ;;  %1986 = vst [vmem:[%s2588_s8 + $0x90] sm:$0xff] %v1902_v5   ;;  %v825_v8 = vadd.f32 %v2579_v15, %v824_v6  ;;  %v953_v9 = vadd.f32 %v2579_v15, %v952_v7  ;;  %v826_v10 = vpop.f32.mrb[13].mxu0  ;;  %v954_v11 = vpop.f32.mrb[13].mxu1 }
 0x14c   : > { %v827_v12 = vpop.f32.mrb[14].mxu0  ;;  %v955_v13 = vpop.f32.mrb[14].mxu1 }
 0x14d   : > { %v828_v14 = vadd.f32 %v2579_v15, %v827_v12  ;;  %v956_v16 = vadd.f32 %v2579_v15, %v955_v13  ;;  %v829_v17 = vpop.f32.mrb[15].mxu0  ;;  %v957_v18 = vpop.f32.mrb[15].mxu1  ;;  %v1061_v19 = vmax.f32 %v825_v8, 0.0  ;;  %v1093_v20 = vmax.f32 %v953_v9, 0.0 }
 0x14f   : > { %v1062_v21 = vmax.f32 %v828_v14, 0.0  ;;  %v1094_v22 = vmax.f32 %v956_v16, 0.0 }
 0x151   : > { %v1827_v23 = vpack.c.bf16 %v1062_v21, %v1061_v19  ;;  %v1907_v24 = vpack.c.bf16 %v1094_v22, %v1093_v20 }
 0x152   : > { %v832_v25 = vpop.f32.mrb[16].mxu0  ;;  %v960_v26 = vpop.f32.mrb[16].mxu1 }
 0x153   : > { %1971 = vst [vmem:[%s2588_s8 + $0x18] sm:$0xff] %v1827_v23   ;;  %1987 = vst [vmem:[%s2588_s8 + $0x98] sm:$0xff] %v1907_v24   ;;  %v833_v27 = vadd.f32 %v2579_v15, %v832_v25  ;;  %v961_v28 = vadd.f32 %v2579_v15, %v960_v26  ;;  %v834_v29 = vpop.f32.mrb[17].mxu0  ;;  %v962_v30 = vpop.f32.mrb[17].mxu1 }
 0x154   : > { %v835_v31 = vpop.f32.mrb[18].mxu0  ;;  %v963_v32 = vpop.f32.mrb[18].mxu1 }
 0x155   : > { %v836_v33 = vadd.f32 %v2579_v15, %v835_v31  ;;  %v964_v34 = vadd.f32 %v2579_v15, %v963_v32  ;;  %v837_v35 = vpop.f32.mrb[19].mxu0  ;;  %v965_v36 = vpop.f32.mrb[19].mxu1  ;;  %v1063_v37 = vmax.f32 %v833_v27, 0.0  ;;  %v1095_v38 = vmax.f32 %v961_v28, 0.0 }
 0x157   : > { %v1064_v39 = vmax.f32 %v836_v33, 0.0  ;;  %v1096_v40 = vmax.f32 %v964_v34, 0.0 }
 0x159   : > { %v1832_v41 = vpack.c.bf16 %v1064_v39, %v1063_v37  ;;  %v1912_v42 = vpack.c.bf16 %v1096_v40, %v1095_v38 }
 0x15a   : > { %v840_v43 = vpop.f32.mrb[20].mxu0  ;;  %v968_v44 = vpop.f32.mrb[20].mxu1 }
 0x15b   : > { %1972 = vst [vmem:[%s2588_s8 + $0x20] sm:$0xff] %v1832_v41   ;;  %1988 = vst [vmem:[%s2588_s8 + $0xa0] sm:$0xff] %v1912_v42   ;;  %v841_v45 = vadd.f32 %v2579_v15, %v840_v43  ;;  %v969_v46 = vadd.f32 %v2579_v15, %v968_v44  ;;  %v842_v47 = vpop.f32.mrb[21].mxu0  ;;  %v970_v48 = vpop.f32.mrb[21].mxu1 }
 0x15c   : > { %v843_v49 = vpop.f32.mrb[22].mxu0  ;;  %v971_v50 = vpop.f32.mrb[22].mxu1 }
 0x15d   : > { %v844_v51 = vadd.f32 %v2579_v15, %v843_v49  ;;  %v972_v52 = vadd.f32 %v2579_v15, %v971_v50  ;;  %v845_v53 = vpop.f32.mrb[23].mxu0  ;;  %v973_v54 = vpop.f32.mrb[23].mxu1  ;;  %v1065_v55 = vmax.f32 %v841_v45, 0.0  ;;  %v1097_v56 = vmax.f32 %v969_v46, 0.0 }
 0x15f   : > { %v1066_v57 = vmax.f32 %v844_v51, 0.0  ;;  %v1098_v58 = vmax.f32 %v972_v52, 0.0 }
 0x161   : > { %v1837_v59 = vpack.c.bf16 %v1066_v57, %v1065_v55  ;;  %v1917_v60 = vpack.c.bf16 %v1098_v58, %v1097_v56 }
 0x162   : > { %v848_v61 = vpop.f32.mrb[24].mxu0  ;;  %v976_v62 = vpop.f32.mrb[24].mxu1 }
 0x163   : > { %1973 = vst [vmem:[%s2588_s8 + $0x28] sm:$0xff] %v1837_v59   ;;  %1989 = vst [vmem:[%s2588_s8 + $0xa8] sm:$0xff] %v1917_v60   ;;  %v849_v63 = vadd.f32 %v2579_v15, %v848_v61  ;;  %v977_v0 = vadd.f32 %v2579_v15, %v976_v62  ;;  %v850_v1 = vpop.f32.mrb[25].mxu0  ;;  %v978_v2 = vpop.f32.mrb[25].mxu1 }
 0x164   : > { %v851_v3 = vpop.f32.mrb[26].mxu0  ;;  %v979_v4 = vpop.f32.mrb[26].mxu1 }
 0x165   : > { %v852_v5 = vadd.f32 %v2579_v15, %v851_v3  ;;  %v980_v6 = vadd.f32 %v2579_v15, %v979_v4  ;;  %v853_v7 = vpop.f32.mrb[27].mxu0  ;;  %v981_v8 = vpop.f32.mrb[27].mxu1  ;;  %v1067_v9 = vmax.f32 %v849_v63, 0.0  ;;  %v1099_v10 = vmax.f32 %v977_v0, 0.0 }
 0x167   : > { %v1068_v11 = vmax.f32 %v852_v5, 0.0  ;;  %v1100_v12 = vmax.f32 %v980_v6, 0.0 }
 0x169   : > { %v1842_v13 = vpack.c.bf16 %v1068_v11, %v1067_v9  ;;  %v1922_v14 = vpack.c.bf16 %v1100_v12, %v1099_v10 }
 0x16a   : > { %v856_v16 = vpop.f32.mrb[28].mxu0  ;;  %v984_v17 = vpop.f32.mrb[28].mxu1 }
 0x16b   : > { %1974 = vst [vmem:[%s2588_s8 + $0x30] sm:$0xff] %v1842_v13   ;;  %1990 = vst [vmem:[%s2588_s8 + $0xb0] sm:$0xff] %v1922_v14   ;;  %v857_v18 = vadd.f32 %v2579_v15, %v856_v16  ;;  %v985_v19 = vadd.f32 %v2579_v15, %v984_v17  ;;  %v858_v20 = vpop.f32.mrb[29].mxu0  ;;  %v986_v21 = vpop.f32.mrb[29].mxu1 }
 0x16c   : > { %v859_v22 = vpop.f32.mrb[30].mxu0  ;;  %v987_v23 = vpop.f32.mrb[30].mxu1 }
 0x16d   : > { %v860_v24 = vadd.f32 %v2579_v15, %v859_v22  ;;  %v988_v25 = vadd.f32 %v2579_v15, %v987_v23  ;;  %v861_v26 = vpop.f32.mrb[31].mxu0  ;;  %v989_v27 = vpop.f32.mrb[31].mxu1  ;;  %v1069_v28 = vmax.f32 %v857_v18, 0.0  ;;  %v1101_v29 = vmax.f32 %v985_v19, 0.0 }
 0x16f   : > { %v1070_v30 = vmax.f32 %v860_v24, 0.0  ;;  %v1102_v31 = vmax.f32 %v988_v25, 0.0 }
 0x171   : > { %v1847_v32 = vpack.c.bf16 %v1070_v30, %v1069_v28  ;;  %v1927_v33 = vpack.c.bf16 %v1102_v31, %v1101_v29 }
 0x172   : > { %v864_v34 = vpop.f32.mrb[32].mxu0  ;;  %v992_v35 = vpop.f32.mrb[32].mxu1 }
 0x173   : > { %1975 = vst [vmem:[%s2588_s8 + $0x38] sm:$0xff] %v1847_v32   ;;  %1991 = vst [vmem:[%s2588_s8 + $0xb8] sm:$0xff] %v1927_v33   ;;  %v865_v36 = vadd.f32 %v2579_v15, %v864_v34  ;;  %v993_v37 = vadd.f32 %v2579_v15, %v992_v35  ;;  %v866_v38 = vpop.f32.mrb[33].mxu0  ;;  %v994_v39 = vpop.f32.mrb[33].mxu1 }
 0x174   : > { %v867_v40 = vpop.f32.mrb[34].mxu0  ;;  %v995_v41 = vpop.f32.mrb[34].mxu1 }
 0x175   : > { %v868_v42 = vadd.f32 %v2579_v15, %v867_v40  ;;  %v996_v43 = vadd.f32 %v2579_v15, %v995_v41  ;;  %v869_v44 = vpop.f32.mrb[35].mxu0  ;;  %v997_v45 = vpop.f32.mrb[35].mxu1  ;;  %v1071_v46 = vmax.f32 %v865_v36, 0.0  ;;  %v1103_v47 = vmax.f32 %v993_v37, 0.0 }
 0x177   : > { %v1072_v48 = vmax.f32 %v868_v42, 0.0  ;;  %v1104_v49 = vmax.f32 %v996_v43, 0.0 }
 0x179   : > { %v1852_v50 = vpack.c.bf16 %v1072_v48, %v1071_v46  ;;  %v1932_v51 = vpack.c.bf16 %v1104_v49, %v1103_v47 }
 0x17a   : > { %v872_v52 = vpop.f32.mrb[36].mxu0  ;;  %v1000_v53 = vpop.f32.mrb[36].mxu1 }
 0x17b   : > { %1976 = vst [vmem:[%s2588_s8 + $0x40] sm:$0xff] %v1852_v50   ;;  %1992 = vst [vmem:[%s2588_s8 + $0xc0] sm:$0xff] %v1932_v51   ;;  %v873_v54 = vadd.f32 %v2579_v15, %v872_v52  ;;  %v1001_v55 = vadd.f32 %v2579_v15, %v1000_v53  ;;  %v874_v56 = vpop.f32.mrb[37].mxu0  ;;  %v1002_v57 = vpop.f32.mrb[37].mxu1 }
 0x17c   : > { %v875_v58 = vpop.f32.mrb[38].mxu0  ;;  %v1003_v59 = vpop.f32.mrb[38].mxu1 }
 0x17d   : > { %v876_v60 = vadd.f32 %v2579_v15, %v875_v58  ;;  %v1004_v61 = vadd.f32 %v2579_v15, %v1003_v59  ;;  %v877_v62 = vpop.f32.mrb[39].mxu0  ;;  %v1005_v63 = vpop.f32.mrb[39].mxu1  ;;  %v1073_v0 = vmax.f32 %v873_v54, 0.0  ;;  %v1105_v1 = vmax.f32 %v1001_v55, 0.0 }
 0x17f   : > { %v1074_v2 = vmax.f32 %v876_v60, 0.0  ;;  %v1106_v3 = vmax.f32 %v1004_v61, 0.0 }
 0x181   : > { %v1857_v4 = vpack.c.bf16 %v1074_v2, %v1073_v0  ;;  %v1937_v5 = vpack.c.bf16 %v1106_v3, %v1105_v1 }
 0x182   : > { %v880_v6 = vpop.f32.mrb[40].mxu0  ;;  %v1008_v7 = vpop.f32.mrb[40].mxu1 }
 0x183   : > { %1977 = vst [vmem:[%s2588_s8 + $0x48] sm:$0xff] %v1857_v4   ;;  %1993 = vst [vmem:[%s2588_s8 + $0xc8] sm:$0xff] %v1937_v5   ;;  %v881_v8 = vadd.f32 %v2579_v15, %v880_v6  ;;  %v1009_v9 = vadd.f32 %v2579_v15, %v1008_v7  ;;  %v882_v10 = vpop.f32.mrb[41].mxu0  ;;  %v1010_v11 = vpop.f32.mrb[41].mxu1 }
 0x184   : > { %v883_v12 = vpop.f32.mrb[42].mxu0  ;;  %v1011_v13 = vpop.f32.mrb[42].mxu1 }
 0x185   : > { %v884_v14 = vadd.f32 %v2579_v15, %v883_v12  ;;  %v1012_v16 = vadd.f32 %v2579_v15, %v1011_v13  ;;  %v885_v17 = vpop.f32.mrb[43].mxu0  ;;  %v1013_v18 = vpop.f32.mrb[43].mxu1  ;;  %v1075_v19 = vmax.f32 %v881_v8, 0.0  ;;  %v1107_v20 = vmax.f32 %v1009_v9, 0.0 }
 0x187   : > { %v1076_v21 = vmax.f32 %v884_v14, 0.0  ;;  %v1108_v22 = vmax.f32 %v1012_v16, 0.0 }
 0x189   : > { %v1862_v23 = vpack.c.bf16 %v1076_v21, %v1075_v19  ;;  %v1942_v24 = vpack.c.bf16 %v1108_v22, %v1107_v20 }
 0x18a   : > { %v888_v25 = vpop.f32.mrb[44].mxu0  ;;  %v1016_v26 = vpop.f32.mrb[44].mxu1 }
 0x18b   : > { %1978 = vst [vmem:[%s2588_s8 + $0x50] sm:$0xff] %v1862_v23   ;;  %1994 = vst [vmem:[%s2588_s8 + $0xd0] sm:$0xff] %v1942_v24   ;;  %v889_v27 = vadd.f32 %v2579_v15, %v888_v25  ;;  %v1017_v28 = vadd.f32 %v2579_v15, %v1016_v26  ;;  %v890_v29 = vpop.f32.mrb[45].mxu0  ;;  %v1018_v30 = vpop.f32.mrb[45].mxu1 }
 0x18c   : > { %v891_v31 = vpop.f32.mrb[46].mxu0  ;;  %v1019_v32 = vpop.f32.mrb[46].mxu1 }
 0x18d   : > { %v892_v33 = vadd.f32 %v2579_v15, %v891_v31  ;;  %v1020_v34 = vadd.f32 %v2579_v15, %v1019_v32  ;;  %v893_v35 = vpop.f32.mrb[47].mxu0  ;;  %v1021_v36 = vpop.f32.mrb[47].mxu1  ;;  %v1077_v37 = vmax.f32 %v889_v27, 0.0  ;;  %v1109_v38 = vmax.f32 %v1017_v28, 0.0 }
 0x18f   : > { %v1078_v39 = vmax.f32 %v892_v33, 0.0  ;;  %v1110_v40 = vmax.f32 %v1020_v34, 0.0 }
 0x191   : > { %v1867_v41 = vpack.c.bf16 %v1078_v39, %v1077_v37  ;;  %v1947_v42 = vpack.c.bf16 %v1110_v40, %v1109_v38 }
 0x192   : > { %v896_v43 = vpop.f32.mrb[48].mxu0  ;;  %v1024_v44 = vpop.f32.mrb[48].mxu1 }
 0x193   : > { %1979 = vst [vmem:[%s2588_s8 + $0x58] sm:$0xff] %v1867_v41   ;;  %1995 = vst [vmem:[%s2588_s8 + $0xd8] sm:$0xff] %v1947_v42   ;;  %v897_v45 = vadd.f32 %v2579_v15, %v896_v43  ;;  %v1025_v46 = vadd.f32 %v2579_v15, %v1024_v44  ;;  %v898_v47 = vpop.f32.mrb[49].mxu0  ;;  %v1026_v48 = vpop.f32.mrb[49].mxu1 }
 0x194   : > { %v899_v49 = vpop.f32.mrb[50].mxu0  ;;  %v1027_v50 = vpop.f32.mrb[50].mxu1 }
 0x195   : > { %v900_v51 = vadd.f32 %v2579_v15, %v899_v49  ;;  %v1028_v52 = vadd.f32 %v2579_v15, %v1027_v50  ;;  %v901_v53 = vpop.f32.mrb[51].mxu0  ;;  %v1029_v54 = vpop.f32.mrb[51].mxu1  ;;  %v1079_v55 = vmax.f32 %v897_v45, 0.0  ;;  %v1111_v56 = vmax.f32 %v1025_v46, 0.0 }
 0x197   : > { %v1080_v57 = vmax.f32 %v900_v51, 0.0  ;;  %v1112_v58 = vmax.f32 %v1028_v52, 0.0 }
 0x199   : > { %v1872_v59 = vpack.c.bf16 %v1080_v57, %v1079_v55  ;;  %v1952_v60 = vpack.c.bf16 %v1112_v58, %v1111_v56 }
 0x19a   : > { %v904_v61 = vpop.f32.mrb[52].mxu0  ;;  %v1032_v62 = vpop.f32.mrb[52].mxu1 }
 0x19b   : > { %1980 = vst [vmem:[%s2588_s8 + $0x60] sm:$0xff] %v1872_v59   ;;  %1996 = vst [vmem:[%s2588_s8 + $0xe0] sm:$0xff] %v1952_v60   ;;  %v905_v63 = vadd.f32 %v2579_v15, %v904_v61  ;;  %v1033_v0 = vadd.f32 %v2579_v15, %v1032_v62  ;;  %v906_v1 = vpop.f32.mrb[53].mxu0  ;;  %v1034_v2 = vpop.f32.mrb[53].mxu1 }
 0x19c   : > { %v907_v3 = vpop.f32.mrb[54].mxu0  ;;  %v1035_v4 = vpop.f32.mrb[54].mxu1 }
 0x19d   : > { %v908_v5 = vadd.f32 %v2579_v15, %v907_v3  ;;  %v1036_v6 = vadd.f32 %v2579_v15, %v1035_v4  ;;  %v909_v7 = vpop.f32.mrb[55].mxu0  ;;  %v1037_v8 = vpop.f32.mrb[55].mxu1  ;;  %v1081_v9 = vmax.f32 %v905_v63, 0.0  ;;  %v1113_v10 = vmax.f32 %v1033_v0, 0.0 }
 0x19f   : > { %v1082_v11 = vmax.f32 %v908_v5, 0.0  ;;  %v1114_v12 = vmax.f32 %v1036_v6, 0.0 }
 0x1a1   : > { %v1877_v13 = vpack.c.bf16 %v1082_v11, %v1081_v9  ;;  %v1957_v14 = vpack.c.bf16 %v1114_v12, %v1113_v10 }
 0x1a2   : > { %v912_v16 = vpop.f32.mrb[56].mxu0  ;;  %v1040_v17 = vpop.f32.mrb[56].mxu1 }
 0x1a3   : > { %1981 = vst [vmem:[%s2588_s8 + $0x68] sm:$0xff] %v1877_v13   ;;  %1997 = vst [vmem:[%s2588_s8 + $0xe8] sm:$0xff] %v1957_v14   ;;  %v913_v18 = vadd.f32 %v2579_v15, %v912_v16  ;;  %v1041_v19 = vadd.f32 %v2579_v15, %v1040_v17  ;;  %v914_v20 = vpop.f32.mrb[57].mxu0  ;;  %v1042_v21 = vpop.f32.mrb[57].mxu1 }
 0x1a4   : > { %v915_v22 = vpop.f32.mrb[58].mxu0  ;;  %v1043_v23 = vpop.f32.mrb[58].mxu1 }
 0x1a5   : > { %v916_v24 = vadd.f32 %v2579_v15, %v915_v22  ;;  %v1044_v25 = vadd.f32 %v2579_v15, %v1043_v23  ;;  %v917_v26 = vpop.f32.mrb[59].mxu0  ;;  %v1045_v27 = vpop.f32.mrb[59].mxu1  ;;  %v1083_v28 = vmax.f32 %v913_v18, 0.0  ;;  %v1115_v29 = vmax.f32 %v1041_v19, 0.0 }
 0x1a7   : > { %v1084_v30 = vmax.f32 %v916_v24, 0.0  ;;  %v1116_v31 = vmax.f32 %v1044_v25, 0.0 }
 0x1a9   : > { %v1882_v32 = vpack.c.bf16 %v1084_v30, %v1083_v28  ;;  %v1962_v33 = vpack.c.bf16 %v1116_v31, %v1115_v29 }
 0x1aa   : > { %v920_v34 = vpop.f32.mrb[60].mxu0  ;;  %v1048_v35 = vpop.f32.mrb[60].mxu1 }
 0x1ab   : > { %1982 = vst [vmem:[%s2588_s8 + $0x70] sm:$0xff] %v1882_v32   ;;  %1998 = vst [vmem:[%s2588_s8 + $0xf0] sm:$0xff] %v1962_v33   ;;  %v921_v36 = vadd.f32 %v2579_v15, %v920_v34  ;;  %v1049_v37 = vadd.f32 %v2579_v15, %v1048_v35  ;;  %v922_v38 = vpop.f32.mrb[61].mxu0  ;;  %v1050_v39 = vpop.f32.mrb[61].mxu1 }
 0x1ac   : > { %v923_v40 = vpop.f32.mrb[62].mxu0  ;;  %v1051_v41 = vpop.f32.mrb[62].mxu1 }
 0x1ad   : > { %v924_v42 = vadd.f32 %v2579_v15, %v923_v40  ;;  %v1052_v43 = vadd.f32 %v2579_v15, %v1051_v41  ;;  %v925_v44 = vpop.f32.mrb[63].mxu0  ;;  %v1053_v45 = vpop.f32.mrb[63].mxu1  ;;  %v1085_v46 = vmax.f32 %v921_v36, 0.0  ;;  %v1117_v47 = vmax.f32 %v1049_v37, 0.0 }
 0x1af   : > { %v1086_v48 = vmax.f32 %v924_v42, 0.0  ;;  %v1118_v49 = vmax.f32 %v1052_v43, 0.0 }
 0x1b1   : > { %v1887_v15 = vpack.c.bf16 %v1086_v48, %v1085_v46  ;;  %v1967_v50 = vpack.c.bf16 %v1118_v49, %v1117_v47 }
 0x1b3   : > { %1983 = vst [vmem:[%s2588_s8 + $0x78] sm:$0xff] %v1887_v15   ;;  %1999 = vst [vmem:[%s2588_s8 + $0xf8] sm:$0xff] %v1967_v50  }
 0x1b4   : > { %2237 = shalt.err (!%p2234_p6)
}
 0x1b5   : > { %s2238_s26 = scalar_lea.hbm %s2685_s19, 4096  ;;  %s2242_s4 = scalar_lea.hbm %s2742_s3, 65536 }
 0x1b6   : > { %p2239_p7 = scmp.ne.s32.totalorder %s2685_s19, %s2238_s26  ;;  %p2243_p0 = scmp.lt.u32.totalorder %s2685_s19, %s2742_s3 }
 0x1b7   : > { %p2244_p2 = scmp.lt.u32.totalorder %s2242_s4, %s2238_s26  ;;  %p2246_p8 = scmp.lt.u32.totalorder %s2238_s26, %s2685_s19 }
 0x1b8   : > { %p2240_p9 = pnand %p2239_p7, %p2754_p10 }
 0x1b9   : > { %p2245_p4 = por %p2244_p2, %p2243_p0 }
 0x1ba   : > { %p2241_p12 = pneg %p2240_p9 }
 0x1bb   : > { %p2247_p11 = por %p2246_p8, %p2245_p4 }
 0x1bd   : > { %p2248_p13 = pnand %p2247_p11, %p2241_p12 }
 0x1bf   : > { %2251 = shalt.err (!%p2248_p13)
}
 0x1c0   : > { %s2312_s7 = smov 64   ;;  %s2313_s8 = smov 4  }
 0x1c1   : > { %2024 = dma.vmem_to_hbm [thread:$0]  (%p2754_p10), %s2687_s10, 4096, %s2685_s19, %s2693_s15, %s2312_s7, %s2312_s7, %s2313_s8  }
 0x1c2 PF: > { %p2036_p1 = scmp.ge.s32.totalorder %s2306_s17, 2  ;;  %s1469_s9 = sand.u32 1, %s2286_s12  }
 0x1c3   : > { %p2755_p3 = scmp.ne.s32.totalorder %s2748_s24, 0  ;;  %s1470_s11 = scalar_lea.sflag [#allocation4], %s1469_s9 }
 0x1c5   : > { %p2031_p5 = pnand %p2036_p1, %p2755_p3 }
 0x1c7   : > { %2281 = dma.done.wait (!%p2031_p5), %s1470_s11, 4096  }
 0x1c8   : > { %2283 = vsyncadd (!%p2031_p5), %s1470_s11, 4294963200  ;;  %s17_s17 = sadd.s32 1, %s2306_s17   ;;  %s2756_s12 = smov %s2290_s13 }
 0x1c9   : > { %p14_p6 = scmp.ge.s32.totalorder %s17_s17, 18   ;;  %s2757_s13 = smov %s2294_s14 }
 0x1ca   : > { %s2758_s14 = smov %s2387_s25  ;;  %s2759_s15 = smov %s2302_s16 }
 0x1cb   : > { %s2760_s16 = smov %s2762_s20  ;;  %16 = sbr.rel (!%p14_p6) target bundleno = 5 (0x5), region = 76 }
 0x1d2   :  { %1475 = vsyncpa [#allocation3], 1 }
 0x1d3   :  { %1477 = vsyncpa [#allocation3 + $0x1], 1 }
 0x1d4   :  { %1478 = vsyncpa [#allocation4], 1 }
 0x1d5   :  { %1480 = vsyncpa [#allocation4 + $0x1], 1 }

</bundles_post_ra>
